<compile_context>
chip_gen: v5e
topology: v5e:2x2
jax: 0.10.0
libtpu: 0.0.40
codegen_flags: <defaults>
</compile_context>

<pallas_src>
import functools

import jax
import jax.numpy as jnp
from jax.experimental import pallas as pl
from jax.experimental.pallas import tpu as pltpu

LANE = 128        # lane width: every feature dim is padded to this
N_LAYERS = 4


def _round_up(x, m):
    return ((x + m - 1) // m) * m


def mlp_kernel(x_ref, w_ref, b_ref, o_ref):
    """Fused 4-layer MLP on one (TB, 128) batch tile.

    w_ref: (4*128, 128) packed weight slab, layer l at rows [l*128, (l+1)*128)
    b_ref: (8, 128) packed bias slab, layer l at row l
    Activations stay in registers; padded lanes are exactly zero throughout.
    """
    h = x_ref[...]
    for l in range(N_LAYERS):
        w = w_ref[pl.ds(l * LANE, LANE), :]          # static slice -> free view
        b = b_ref[pl.ds(l, 1), :]                    # (1, 128)
        h = jnp.dot(h, w, preferred_element_type=jnp.float32) + b
        if l < N_LAYERS - 1:
            h = jnp.maximum(h, 0.0)
    o_ref[...] = h.astype(o_ref.dtype)


def pack_params(params):
    """Pack the 4 (w, b) pairs into one padded weight slab + one bias slab.

    Weight layer l lives at rows [l*128, (l+1)*128) of a (512, 128) slab,
    biases at row l of an (8, 128) slab.  Unused entries are zero, which keeps
    the padded computation exact.
    """
    w_slab = jnp.zeros((N_LAYERS * LANE, LANE), jnp.float32)
    b_slab = jnp.zeros((8, LANE), jnp.float32)
    for l in range(N_LAYERS):
        w = params[f"w{l + 1}"]
        b = params[f"b{l + 1}"].reshape(-1)
        w_slab = w_slab.at[l * LANE:l * LANE + w.shape[0], :w.shape[1]].set(w)
        b_slab = b_slab.at[l, :b.shape[0]].set(b)
    return w_slab, b_slab


@functools.partial(jax.jit, static_argnames=("input_size", "nb_actions"))
def network_forward(state, w_slab, b_slab, *, input_size, nb_actions):
    """state: (batch, input_size) f32 -> (batch, nb_actions) f32 Q-values."""
    batch = state.shape[0]

    # Batch tile: full (8-aligned) batch for small inputs; 512-row tiles when
    # the batch is large (keeps every tile <= ~256 KiB, fine for v7x VMEM).
    tb = 512 if batch > 512 else max(8, _round_up(batch, 8))
    batch_padded = _round_up(batch, tb)
    grid_b = batch_padded // tb

    # Pad state to a lane/sublane-aligned slab (zeros are exact, see above).
    state_p = jnp.zeros((batch_padded, LANE), jnp.float32)
    state_p = state_p.at[:batch, :input_size].set(state.astype(jnp.float32))

    out_padded = pl.pallas_call(
        mlp_kernel,
        out_shape=jax.ShapeDtypeStruct((batch_padded, LANE), jnp.float32),
        grid_spec=pltpu.PrefetchScalarGridSpec(
            num_scalar_prefetch=0,
            grid=(grid_b,),
            in_specs=[
                # Batch-tiled activations.
                pl.BlockSpec((tb, LANE), lambda i: (i, 0)),
                # Parameters: constant index_map -> VMEM-resident across steps.
                pl.BlockSpec(w_slab.shape, lambda i: (0, 0)),
                pl.BlockSpec(b_slab.shape, lambda i: (0, 0)),
            ],
            out_specs=pl.BlockSpec((tb, LANE), lambda i: (i, 0)),
        ),
        compiler_params=pltpu.CompilerParams(
            dimension_semantics=("parallel",),   # megacore sharding on v7x
        ),
    )(state_p, w_slab, b_slab)

    return out_padded[:batch, :nb_actions]


def init_params(key, input_size, nb_actions):
    """Deterministic init mirroring PyTorch nn.Linear default:
       U(-1/sqrt(fan_in), 1/sqrt(fan_in)) for both weight and bias.
       Weights stored as (in_features, out_features) so forward is x @ W + b."""
    dims = [(input_size, 30), (30, 30), (30, 30), (30, nb_actions)]
    params = {}
    for i, (fan_in, fan_out) in enumerate(dims, start=1):
        key, kw, kb = jax.random.split(key, 3)
        bound = 1.0 / jnp.sqrt(jnp.float32(fan_in))
        params[f"w{i}"] = jax.random.uniform(
            kw, (fan_in, fan_out), jnp.float32, -bound, bound)
        params[f"b{i}"] = jax.random.uniform(
            kb, (1, fan_out), jnp.float32, -bound, bound)
    return params


def reference_forward(state, params):
    h = state
    for i in range(1, 4):
        h = jnp.maximum(h @ params[f"w{i}"] + params[f"b{i}"], 0.0)
    return h @ params["w4"] + params["b4"]


if __name__ == "__main__":
    input_size = 16
    nb_actions = 4
    batch = 2

    key = jax.random.PRNGKey(0)
    key, kx = jax.random.split(key)
    state = jax.random.normal(kx, (batch, input_size), jnp.float32)
    params = init_params(key, input_size, nb_actions)

    # Pack parameters once (outside the per-step forward call).
    w_slab, b_slab = pack_params(params)

    q_values = network_forward(state, w_slab, b_slab,
                               input_size=input_size, nb_actions=nb_actions)
    q_values = jax.block_until_ready(q_values)

    ref = reference_forward(state, params)
    assert q_values.shape == (batch, nb_actions)
    assert jnp.allclose(q_values, ref, atol=1e-5, rtol=1e-5)

    print("KERNEL_OK")
</pallas_src>

<mosaic_0001>
module attributes {stable_mosaic.version = 11 : i64} {
  func.func @mlp_kernel(%arg0: i32, %arg1: memref<8x128xf32, #tpu.memory_space<vmem>>, %arg2: memref<512x128xf32, #tpu.memory_space<vmem>>, %arg3: memref<8x128xf32, #tpu.memory_space<vmem>>, %arg4: memref<8x128xf32, #tpu.memory_space<vmem>>) attributes {dimension_semantics = [#tpu.dimension_semantics<parallel>], iteration_bounds = array<i64: 1>, scalar_prefetch = 0 : i64, scratch_operands = 0 : i64, tpu.core_type = #tpu.core_type<tc>, window_params = [{transform_indices = @transform_0, window_bounds = array<i64: 8, 128>}, {pipeline_mode = #tpu.pipeline_mode<synchronous>, transform_indices = @transform_1, window_bounds = array<i64: 512, 128>}, {pipeline_mode = #tpu.pipeline_mode<synchronous>, transform_indices = @transform_2, window_bounds = array<i64: 8, 128>}, {transform_indices = @transform_3, window_bounds = array<i64: 8, 128>}]} {
    %c0 = arith.constant 0 : index
    %c0_0 = arith.constant 0 : index
    %0 = vector.load %arg1[%c0, %c0_0] : memref<8x128xf32, #tpu.memory_space<vmem>>, vector<8x128xf32>
    %c0_1 = arith.constant 0 : index
    %c0_2 = arith.constant 0 : index
    %1 = vector.load %arg2[%c0_1, %c0_2] : memref<512x128xf32, #tpu.memory_space<vmem>>, vector<128x128xf32>
    %c0_3 = arith.constant 0 : index
    %c0_4 = arith.constant 0 : index
    %2 = vector.load %arg3[%c0_3, %c0_4] : memref<8x128xf32, #tpu.memory_space<vmem>>, vector<1x128xf32>
    %cst = arith.constant dense<0.000000e+00> : vector<8x128xf32>
    %3 = tpu.matmul %0, %1, %cst {dimension_numbers = #tpu.dot_dimension_numbers<[1], [0], [0], [1], [0, 0, 1, 1], [], []>} : vector<8x128xf32>, vector<128x128xf32>, vector<8x128xf32> -> vector<8x128xf32>
    %4 = vector.broadcast %2 : vector<1x128xf32> to vector<8x128xf32>
    %5 = arith.addf %3, %4 : vector<8x128xf32>
    %cst_5 = arith.constant 0.000000e+00 : f32
    %6 = vector.broadcast %cst_5 : f32 to vector<8x128xf32>
    %7 = arith.maximumf %5, %6 : vector<8x128xf32>
    %c128 = arith.constant 128 : index
    %c0_6 = arith.constant 0 : index
    %8 = vector.load %arg2[%c128, %c0_6] : memref<512x128xf32, #tpu.memory_space<vmem>>, vector<128x128xf32>
    %c1 = arith.constant 1 : index
    %c0_7 = arith.constant 0 : index
    %9 = vector.load %arg3[%c1, %c0_7] : memref<8x128xf32, #tpu.memory_space<vmem>>, vector<1x128xf32>
    %cst_8 = arith.constant dense<0.000000e+00> : vector<8x128xf32>
    %10 = tpu.matmul %7, %8, %cst_8 {dimension_numbers = #tpu.dot_dimension_numbers<[1], [0], [0], [1], [0, 0, 1, 1], [], []>} : vector<8x128xf32>, vector<128x128xf32>, vector<8x128xf32> -> vector<8x128xf32>
    %11 = vector.broadcast %9 : vector<1x128xf32> to vector<8x128xf32>
    %12 = arith.addf %10, %11 : vector<8x128xf32>
    %cst_9 = arith.constant 0.000000e+00 : f32
    %13 = vector.broadcast %cst_9 : f32 to vector<8x128xf32>
    %14 = arith.maximumf %12, %13 : vector<8x128xf32>
    %c256 = arith.constant 256 : index
    %c0_10 = arith.constant 0 : index
    %15 = vector.load %arg2[%c256, %c0_10] : memref<512x128xf32, #tpu.memory_space<vmem>>, vector<128x128xf32>
    %c2 = arith.constant 2 : index
    %c0_11 = arith.constant 0 : index
    %16 = vector.load %arg3[%c2, %c0_11] : memref<8x128xf32, #tpu.memory_space<vmem>>, vector<1x128xf32>
    %cst_12 = arith.constant dense<0.000000e+00> : vector<8x128xf32>
    %17 = tpu.matmul %14, %15, %cst_12 {dimension_numbers = #tpu.dot_dimension_numbers<[1], [0], [0], [1], [0, 0, 1, 1], [], []>} : vector<8x128xf32>, vector<128x128xf32>, vector<8x128xf32> -> vector<8x128xf32>
    %18 = vector.broadcast %16 : vector<1x128xf32> to vector<8x128xf32>
    %19 = arith.addf %17, %18 : vector<8x128xf32>
    %cst_13 = arith.constant 0.000000e+00 : f32
    %20 = vector.broadcast %cst_13 : f32 to vector<8x128xf32>
    %21 = arith.maximumf %19, %20 : vector<8x128xf32>
    %c384 = arith.constant 384 : index
    %c0_14 = arith.constant 0 : index
    %22 = vector.load %arg2[%c384, %c0_14] : memref<512x128xf32, #tpu.memory_space<vmem>>, vector<128x128xf32>
    %c3 = arith.constant 3 : index
    %c0_15 = arith.constant 0 : index
    %23 = vector.load %arg3[%c3, %c0_15] : memref<8x128xf32, #tpu.memory_space<vmem>>, vector<1x128xf32>
    %cst_16 = arith.constant dense<0.000000e+00> : vector<8x128xf32>
    %24 = tpu.matmul %21, %22, %cst_16 {dimension_numbers = #tpu.dot_dimension_numbers<[1], [0], [0], [1], [0, 0, 1, 1], [], []>} : vector<8x128xf32>, vector<128x128xf32>, vector<8x128xf32> -> vector<8x128xf32>
    %25 = vector.broadcast %23 : vector<1x128xf32> to vector<8x128xf32>
    %26 = arith.addf %24, %25 : vector<8x128xf32>
    %c0_17 = arith.constant 0 : index
    %c0_18 = arith.constant 0 : index
    %27 = vector.load %arg4[%c0_17, %c0_18] : memref<8x128xf32, #tpu.memory_space<vmem>>, vector<8x128xf32>
    tpu.vector_store %arg4[%c0_17, %c0_18], %26 {strides = array<i32>} : memref<8x128xf32, #tpu.memory_space<vmem>>, vector<8x128xf32>,
    return
  }
  func.func @transform_0(%arg0: i32) -> (i32, i32) {
    %c0_i32 = arith.constant 0 : i32
    %c0_i32_0 = arith.constant 0 : i32
    return %arg0, %c0_i32 : i32, i32
  }
  func.func @transform_1(%arg0: i32) -> (i32, i32) {
    %c0_i32 = arith.constant 0 : i32
    %c0_i32_0 = arith.constant 0 : i32
    %c0_i32_1 = arith.constant 0 : i32
    return %c0_i32, %c0_i32_0 : i32, i32
  }
  func.func @transform_2(%arg0: i32) -> (i32, i32) {
    %c0_i32 = arith.constant 0 : i32
    %c0_i32_0 = arith.constant 0 : i32
    %c0_i32_1 = arith.constant 0 : i32
    return %c0_i32, %c0_i32_0 : i32, i32
  }
  func.func @transform_3(%arg0: i32) -> (i32, i32) {
    %c0_i32 = arith.constant 0 : i32
    %c0_i32_0 = arith.constant 0 : i32
    return %arg0, %c0_i32 : i32, i32
  }
}

</mosaic_0001>

<bundles_post_ra>
// kernel: network_forward.1
= control target key start
LH: loop header
LB: loop body
LE: loop exit
PB: predicated region body
PF: predicated region fallthrough
CT: control target
= control target key end

     0   :  { %8 = vsyncpa [#allocation3], 0  ;;  %s225_s15 = smov [#allocation2]   ;;  %s226_s17 = smov 128   ;;  %s269_s0 = inlined_call_operand.vmem [shape: f32[8,128], index: 0, kind: input, shape index: {}]   ;;  %s270_s1 = inlined_call_operand.hbm [shape: f32[512,128], index: 1, kind: input, shape index: {}]   ;;  %s271_s2 = inlined_call_operand.vmem [shape: f32[8,128], index: 2, kind: input, shape index: {}]   ;;  %s272_s3 = inlined_call_operand.vmem [shape: f32[8,128], index: 3, kind: output, shape index: {}]  }
   0x1   :  { %s15_s14 = sshll.u32 %s270_s1, 4  ;;  %s17_s16 = sshll.u32 %s225_s15, 4  ;;  %s16_s14 = int_to_ptr.hbm [resolvable:$true] %s15_s14  ;;  %s18_s16 = int_to_ptr.vmem [resolvable:$true] %s17_s16 }
   0x2   :  { %s227_s18 = smov 8  }
   0x3   :  { %23 = dma.hbm_to_vmem [thread:$0]  %s16_s14, 8192, %s18_s16, [#allocation3], %s226_s17, %s226_s17, %s227_s18  }
   0x4   :  { %223 = dma.done.wait [#allocation3], 8192  }
   0x5   :  { %224 = vsyncadd [#allocation3], 4294959104  ;;  %v46_v0 = vld [vmem:[#allocation2 + $0x78] sm:$0xff]  ;;  %v45_v1 = vld [vmem:[#allocation2 + $0x70] sm:$0xff] }
   0x6   :  { %49 = vmatpush.msra.mxu0 %v46_v0  ;;  %v44_v2 = vld [vmem:[#allocation2 + $0x68] sm:$0xff]  ;;  %v43_v3 = vld [vmem:[#allocation2 + $0x60] sm:$0xff]  ;;  %v85_v4 = vld [vmem:[#allocation2 + $0xf8] sm:$0xff] }
   0x7   :  { %v42_v5 = vld [vmem:[#allocation2 + $0x58] sm:$0xff]  ;;  %88 = vmatpush.msra.mxu1 %v85_v4  ;;  %v84_v6 = vld [vmem:[#allocation2 + $0xf0] sm:$0xff]  ;;  %v83_v7 = vld [vmem:[#allocation2 + $0xe8] sm:$0xff] }
   0x8   :  { %50 = vmatpush.msra.mxu0 %v45_v1  ;;  %v41_v8 = vld [vmem:[#allocation2 + $0x50] sm:$0xff]  ;;  %v82_v9 = vld [vmem:[#allocation2 + $0xe0] sm:$0xff]  ;;  %v40_v10 = vld [vmem:[#allocation2 + $0x48] sm:$0xff] }
   0x9   :  { %89 = vmatpush.msra.mxu1 %v84_v6  ;;  %v81_v11 = vld [vmem:[#allocation2 + $0xd8] sm:$0xff]  ;;  %v39_v12 = vld [vmem:[#allocation2 + $0x40] sm:$0xff]  ;;  %v80_v13 = vld [vmem:[#allocation2 + $0xd0] sm:$0xff] }
   0xa   :  { %51 = vmatpush.msra.mxu0 %v44_v2  ;;  %v38_v14 = vld [vmem:[#allocation2 + $0x38] sm:$0xff]  ;;  %v79_v15 = vld [vmem:[#allocation2 + $0xc8] sm:$0xff]  ;;  %v37_v16 = vld [vmem:[#allocation2 + $0x30] sm:$0xff] }
   0xb   :  { %90 = vmatpush.msra.mxu1 %v83_v7  ;;  %v78_v17 = vld [vmem:[#allocation2 + $0xc0] sm:$0xff]  ;;  %v36_v18 = vld [vmem:[#allocation2 + $0x28] sm:$0xff]  ;;  %v77_v19 = vld [vmem:[#allocation2 + $0xb8] sm:$0xff] }
   0xc   :  { %52 = vmatpush.msra.mxu0 %v43_v3  ;;  %v35_v20 = vld [vmem:[#allocation2 + $0x20] sm:$0xff]  ;;  %v76_v21 = vld [vmem:[#allocation2 + $0xb0] sm:$0xff]  ;;  %v34_v22 = vld [vmem:[#allocation2 + $0x18] sm:$0xff] }
   0xd   :  { %91 = vmatpush.msra.mxu1 %v82_v9  ;;  %v75_v23 = vld [vmem:[#allocation2 + $0xa8] sm:$0xff]  ;;  %v33_v24 = vld [vmem:[#allocation2 + $0x10] sm:$0xff]  ;;  %v74_v25 = vld [vmem:[#allocation2 + $0xa0] sm:$0xff] }
   0xe   :  { %53 = vmatpush.msra.mxu0 %v42_v5  ;;  %v32_v26 = vld [vmem:[#allocation2 + $0x8] sm:$0xff]  ;;  %v73_v27 = vld [vmem:[#allocation2 + $0x98] sm:$0xff]  ;;  %v31_v28 = vld [vmem:[#allocation2] sm:$0xff] }
   0xf   :  { %92 = vmatpush.msra.mxu1 %v81_v11  ;;  %v30_v29 = vld [vmem:[%s269_s0] sm:$0xff]  ;;  %v72_v30 = vld [vmem:[#allocation2 + $0x90] sm:$0xff]  ;;  %v71_v31 = vld [vmem:[#allocation2 + $0x88] sm:$0xff] }
  0x10   :  { %54 = vmatpush.msra.mxu0 %v41_v8  ;;  %v70_v32 = vld [vmem:[#allocation2 + $0x80] sm:$0xff]  ;;  %v124_v33 = vld [vmem:[#allocation2 + $0x178] sm:$0xff]  ;;  %v123_v34 = vld [vmem:[#allocation2 + $0x170] sm:$0xff] }
  0x11   :  { %93 = vmatpush.msra.mxu1 %v80_v13  ;;  %127 = vmatpush.msra.mxu2 %v124_v33  ;;  %v122_v35 = vld [vmem:[#allocation2 + $0x168] sm:$0xff]  ;;  %v121_v36 = vld [vmem:[#allocation2 + $0x160] sm:$0xff]  ;;  %v120_v37 = vld [vmem:[#allocation2 + $0x158] sm:$0xff] }
  0x12   :  { %55 = vmatpush.msra.mxu0 %v40_v10  ;;  %v119_v38 = vld [vmem:[#allocation2 + $0x150] sm:$0xff]  ;;  %v118_v39 = vld [vmem:[#allocation2 + $0x148] sm:$0xff]  ;;  %v117_v40 = vld [vmem:[#allocation2 + $0x140] sm:$0xff] }
  0x13   :  { %94 = vmatpush.msra.mxu1 %v79_v15  ;;  %128 = vmatpush.msra.mxu2 %v123_v34  ;;  %v116_v41 = vld [vmem:[#allocation2 + $0x138] sm:$0xff]  ;;  %v115_v42 = vld [vmem:[#allocation2 + $0x130] sm:$0xff]  ;;  %v114_v43 = vld [vmem:[#allocation2 + $0x128] sm:$0xff] }
  0x14   :  { %56 = vmatpush.msra.mxu0 %v39_v12  ;;  %v113_v44 = vld [vmem:[#allocation2 + $0x120] sm:$0xff]  ;;  %v112_v45 = vld [vmem:[#allocation2 + $0x118] sm:$0xff]  ;;  %v111_v50 = vld [vmem:[#allocation2 + $0x110] sm:$0xff] }
  0x15   :  { %95 = vmatpush.msra.mxu1 %v78_v17  ;;  %129 = vmatpush.msra.mxu2 %v122_v35  ;;  %v195_v46 = vld [vmem:[%s271_s2] ss:$0 sm:$0xff]  ;;  %v110_v51 = vld [vmem:[#allocation2 + $0x108] sm:$0xff]  ;;  %v163_v53 = vld [vmem:[#allocation2 + $0x1f8] sm:$0xff] }
  0x16   :  { %57 = vmatpush.msra.mxu0 %v38_v14  ;;  %v109_v52 = vld [vmem:[#allocation2 + $0x100] sm:$0xff]  ;;  %v162_v54 = vld [vmem:[#allocation2 + $0x1f0] sm:$0xff]  ;;  %166 = vmatpush.msra.mxu3 %v163_v53  ;;  %v161_v55 = vld [vmem:[#allocation2 + $0x1e8] sm:$0xff] }
  0x17   :  { %96 = vmatpush.msra.mxu1 %v77_v19  ;;  %130 = vmatpush.msra.mxu2 %v121_v36  ;;  %v160_v56 = vld [vmem:[#allocation2 + $0x1e0] sm:$0xff]  ;;  %v159_v57 = vld [vmem:[#allocation2 + $0x1d8] sm:$0xff]  ;;  %v158_v58 = vld [vmem:[#allocation2 + $0x1d0] sm:$0xff] }
  0x18   :  { %58 = vmatpush.msra.mxu0 %v37_v16  ;;  %167 = vmatpush.msra.mxu3 %v162_v54  ;;  %v157_v59 = vld [vmem:[#allocation2 + $0x1c8] sm:$0xff]  ;;  %v156_v60 = vld [vmem:[#allocation2 + $0x1c0] sm:$0xff]  ;;  %v155_v61 = vld [vmem:[#allocation2 + $0x1b8] sm:$0xff] }
  0x19   :  { %97 = vmatpush.msra.mxu1 %v76_v21  ;;  %131 = vmatpush.msra.mxu2 %v120_v37  ;;  %v154_v62 = vld [vmem:[#allocation2 + $0x1b0] sm:$0xff]  ;;  %v153_v63 = vld [vmem:[#allocation2 + $0x1a8] sm:$0xff]  ;;  %v152_v0 = vld [vmem:[#allocation2 + $0x1a0] sm:$0xff] }
  0x1a   :  { %59 = vmatpush.msra.mxu0 %v36_v18  ;;  %168 = vmatpush.msra.mxu3 %v161_v55  ;;  %v151_v1 = vld [vmem:[#allocation2 + $0x198] sm:$0xff]  ;;  %v196_v2 = vld [vmem:[%s271_s2 + $0x1] ss:$0 sm:$0xff]  ;;  %v150_v6 = vld [vmem:[#allocation2 + $0x190] sm:$0xff] }
  0x1b   :  { %98 = vmatpush.msra.mxu1 %v75_v23  ;;  %132 = vmatpush.msra.mxu2 %v119_v38  ;;  %v149_v7 = vld [vmem:[#allocation2 + $0x188] sm:$0xff]  ;;  %v148_v8 = vld [vmem:[#allocation2 + $0x180] sm:$0xff] }
  0x1c   :  { %60 = vmatpush.msra.mxu0 %v35_v20  ;;  %169 = vmatpush.msra.mxu3 %v160_v56  ;;  %v197_v9 = vld [vmem:[%s271_s2 + $0x2] ss:$0 sm:$0xff]  ;;  %v198_v13 = vld [vmem:[%s271_s2 + $0x3] ss:$0 sm:$0xff] }
  0x1d   :  { %99 = vmatpush.msra.mxu1 %v74_v25  ;;  %133 = vmatpush.msra.mxu2 %v118_v39 }
  0x1e   :  { %61 = vmatpush.msra.mxu0 %v34_v22  ;;  %170 = vmatpush.msra.mxu3 %v159_v57 }
  0x1f   :  { %100 = vmatpush.msra.mxu1 %v73_v27  ;;  %134 = vmatpush.msra.mxu2 %v117_v40 }
  0x20   :  { %62 = vmatpush.msra.mxu0 %v33_v24  ;;  %171 = vmatpush.msra.mxu3 %v158_v58 }
  0x21   :  { %101 = vmatpush.msra.mxu1 %v72_v30  ;;  %135 = vmatpush.msra.mxu2 %v116_v41 }
  0x22   :  { %63 = vmatpush.msra.mxu0 %v32_v26  ;;  %172 = vmatpush.msra.mxu3 %v157_v59 }
  0x23   :  { %102 = vmatpush.msra.mxu1 %v71_v31  ;;  %136 = vmatpush.msra.mxu2 %v115_v42 }
  0x24   :  { %64 = vmatpush.msra.mxu0 %v31_v28  ;;  %173 = vmatpush.msra.mxu3 %v156_v60 }
  0x25   :  { %65 = vmatmul.f32.vlgmr.msra.gmra.mxu0 %v30_v29  ;;  %103 = vmatpush.msra.mxu1 %v70_v32 }
  0x26   :  { %137 = vmatpush.msra.mxu2 %v114_v43  ;;  %174 = vmatpush.msra.mxu3 %v155_v61 }
  0x28   :  { %138 = vmatpush.msra.mxu2 %v113_v44  ;;  %175 = vmatpush.msra.mxu3 %v154_v62 }
  0x2a   :  { %139 = vmatpush.msra.mxu2 %v112_v45  ;;  %176 = vmatpush.msra.mxu3 %v153_v63 }
  0x2c   :  { %140 = vmatpush.msra.mxu2 %v111_v50  ;;  %177 = vmatpush.msra.mxu3 %v152_v0 }
  0x2e   :  { %141 = vmatpush.msra.mxu2 %v110_v51  ;;  %178 = vmatpush.msra.mxu3 %v151_v1 }
  0x30   :  { %142 = vmatpush.msra.mxu2 %v109_v52  ;;  %179 = vmatpush.msra.mxu3 %v150_v6 }
  0x32   :  { %180 = vmatpush.msra.mxu3 %v149_v7 }
  0x34   :  { %181 = vmatpush.msra.mxu3 %v148_v8 }
  0xa2   :  { %v66_v47 = vpop.f32.mrf.mxu0 }
  0xa3   :  { %v67_v48 = vadd.f32 %v195_v46, %v66_v47 }
  0xa5   :  { %v69_v49 = vmax.f32 %v67_v48, 0.0 }
  0xa7   :  { %104 = vmatmul.f32.vlgmr.msra.gmra.mxu1 %v69_v49 }
 0x124   :  { %v105_v3 = vpop.f32.mrf.mxu1 }
 0x125   :  { %v106_v4 = vadd.f32 %v196_v2, %v105_v3 }
 0x127   :  { %v108_v5 = vmax.f32 %v106_v4, 0.0 }
 0x129   :  { %143 = vmatmul.f32.vlgmr.msra.gmra.mxu2 %v108_v5 }
 0x1ac   :  { %v144_v10 = vpop.f32.mrf.mxu2 }
 0x1ad   :  { %v145_v11 = vadd.f32 %v197_v9, %v144_v10 }
 0x1af   :  { %v147_v12 = vmax.f32 %v145_v11, 0.0 }
 0x1b1   :  { %182 = vmatmul.f32.vlgmr.msra.gmra.mxu3 %v147_v12 }
 0x234   :  { %v183_v14 = vpop.f32.mrf.mxu3 }
 0x235   :  { %v184_v15 = vadd.f32 %v198_v13, %v183_v14 }
 0x237   :  { %186 = vst [vmem:[%s272_s3] sm:$0xff] %v184_v15 }
 0x238   :  { %191 = vsyncpa [#allocation3], 1 }

</bundles_post_ra>
